<compile_context>
chip_gen: v7x
topology: tpu7x:2x2x1
jax: 0.10.0
libtpu: 0.0.40
codegen_flags: <defaults>
</compile_context>

<pallas_src>
import jax
import jax.numpy as jnp
from jax.experimental import pallas as pl
from jax.experimental.pallas import tpu as pltpu

NUM_X = 40
NUM_Y = 40
P = NUM_X * NUM_Y          # 1600 default anchor points
MIN_DIST = 0.025
EPS = 1e-8                 # used by the torch-faithful reference
POS_NEG_WEIGHT = 3.0       # literal 3 in the torch forward


def _round_up(x, m):
    return (x + m - 1) // m * m


def custom_loss_pallas(predictions, labels, *, batch_tile=None, label_tile=None):
    """predictions: (B, C>=1, 1600); labels: (B, 2) or (B, 1, 2). Returns scalar."""
    bsz, nchan, npts = predictions.shape
    assert npts == P, f"expected {P} anchor points, got {npts}"
    labels = labels.astype(jnp.float32).reshape(bsz, 2)

    # ---------------- stage 1: batch-tiled log-loss reduction ----------------
    # (B, C, P) -> (B, C*P) is a free contiguous view; a lane window of
    # round_up(P, 128) lanes fetches channel 0 only (plus 64 spill lanes).
    preds2d = predictions.reshape(bsz, nchan * npts)
    lane_win = min(_round_up(P, 128), nchan * npts)            # 1664 for C=3

    if batch_tile is None:
        tb = bsz if bsz <= 8 else min(512, _round_up(bsz, 8))
    else:
        tb = batch_tile
    nt = pl.cdiv(bsz, tb)
    pad_rows = (bsz % tb) != 0

    def stage1_kernel(pred_ref, pos_out_ref, neg_out_ref):
        # pred_ref: (tb, lane_win) window of the (B, C*P) view, native dtype.
        p0 = pred_ref[:, :P].astype(jnp.float32)               # channel 0 only
        if pad_rows:                                            # static guard
            row = (jax.lax.broadcasted_iota(jnp.int32, (tb, 1), 0)
                   + pl.program_id(0) * tb)
            p0 = jnp.where(row < bsz, p0, 0.0)                  # keep padding finite
        t = 2.0 * p0 - 1.0
        # pos_log = -log(sigmoid(t)) = softplus(-t); neg_log = softplus(t).
        soft = jnp.log(1.0 + jnp.exp(-jnp.abs(t)))              # 1 exp + 1 log (EUP)
        pos_log = jnp.maximum(-t, 0.0) + soft
        neg_log = pos_log + t
        if pad_rows:
            rmask = (row < bsz).astype(jnp.float32)
            pos_log = pos_log * rmask
            neg_log = neg_log * rmask
        pos_out_ref[...] = jnp.sum(pos_log, axis=0, keepdims=True)[None]
        neg_out_ref[...] = jnp.sum(neg_log, axis=0, keepdims=True)[None]

    itemsize = jnp.dtype(preds2d.dtype).itemsize
    part_pos, part_neg = pl.pallas_call(
        stage1_kernel,
        grid=(nt,),
        out_shape=(jax.ShapeDtypeStruct((nt, 1, P), jnp.float32),
                   jax.ShapeDtypeStruct((nt, 1, P), jnp.float32)),
        in_specs=[pl.BlockSpec((tb, lane_win), lambda i: (i, 0))],
        out_specs=(pl.BlockSpec((1, 1, P), lambda i: (i, 0, 0)),
                   pl.BlockSpec((1, 1, P), lambda i: (i, 0, 0))),
        compiler_params=pltpu.CompilerParams(
            dimension_semantics=("parallel",),
            vmem_limit_bytes=32 * 1024 * 1024),
        cost_estimate=pl.CostEstimate(
            flops=12 * bsz * P,
            transcendentals=2 * bsz * P,
            bytes_accessed=bsz * lane_win * itemsize + 2 * nt * P * 4),
    )(preds2d)

    # Tiny cross-tile reduction (a few KB) left to XLA so the batch grid axis
    # stays fully parallel (no single-SMEM-scalar accumulation across grid).
    s_pos = jnp.sum(part_pos, axis=0)                           # (1, P)
    s_neg = jnp.sum(part_neg, axis=0)                           # (1, P)

    # ---------------- stage 2: per-label anchor matching ---------------------
    if label_tile is None:
        tl = bsz if bsz <= 8 else min(256, _round_up(bsz, 8))
    else:
        tl = label_tile
    nlt = pl.cdiv(bsz, tl)
    pad_labels = (bsz % tl) != 0

    def stage2_kernel(s_pos_ref, s_neg_ref, lab_ref, out_ref):
        sp = s_pos_ref[...]                                     # (1, P)
        sn = s_neg_ref[...]                                     # (1, P)
        total_neg = jnp.sum(sn)                                 # hoisted total

        # Default anchors (torch.cartesian_prod order, x-major), in-register.
        # (i + 0.5)/N is mathematically identical to torch.linspace(1/2N, 1-1/2N, N).
        pf = jax.lax.broadcasted_iota(jnp.int32, (1, P), 1).astype(jnp.float32)
        ix = jnp.floor((pf + 0.5) * jnp.float32(1.0 / NUM_Y))   # p // NUM_Y (exact)
        iy = pf - jnp.float32(NUM_Y) * ix                       # p %  NUM_Y (exact)
        dp_x = (ix + 0.5) * jnp.float32(1.0 / NUM_X)
        dp_y = (iy + 0.5) * jnp.float32(1.0 / NUM_Y)

        lab = lab_ref[...]                                      # (tl, 2)
        dist = jnp.abs(dp_x - lab[:, 0:1]) + jnp.abs(dp_y - lab[:, 1:2])
        pos_mask = (dist <= MIN_DIST).astype(jnp.float32)       # (tl, P)

        # The torch topk-based negative set is exactly (dist > MIN_DIST),
        # i.e. 1 - pos_mask, so the neg term is total - masked.
        num_pos = jnp.sum(pos_mask, axis=1, keepdims=True)      # (tl, 1)
        pos_term = jnp.sum(sp * pos_mask, axis=1, keepdims=True)
        neg_masked = jnp.sum(sn * pos_mask, axis=1, keepdims=True)
        neg_term = total_neg - neg_masked
        num_neg = jnp.float32(P) - num_pos

        # Like torch, num_pos == 0 (label outside the grid) is undefined (inf).
        per_label = pos_term / num_pos + POS_NEG_WEIGHT * neg_term / num_neg
        if pad_labels:                                          # static guard
            row = (jax.lax.broadcasted_iota(jnp.int32, (tl, 1), 0)
                   + pl.program_id(0) * tl)
            per_label = jnp.where(row < bsz, per_label, 0.0)
        partial = jnp.sum(per_label) / jnp.float32(bsz)
        out_ref[...] = jnp.full((1, 128), partial, dtype=jnp.float32)

    partials = pl.pallas_call(
        stage2_kernel,
        grid=(nlt,),
        out_shape=jax.ShapeDtypeStruct((1, nlt * 128), jnp.float32),
        in_specs=[pl.BlockSpec(memory_space=pltpu.MemorySpace.VMEM),  # s_pos
                  pl.BlockSpec(memory_space=pltpu.MemorySpace.VMEM),  # s_neg
                  pl.BlockSpec((tl, 2), lambda j: (j, 0))],           # labels
        out_specs=pl.BlockSpec((1, 128), lambda j: (0, j)),
        compiler_params=pltpu.CompilerParams(
            dimension_semantics=("parallel",)),
    )(s_pos, s_neg, labels)

    return jnp.sum(partials.reshape(nlt, 128)[:, 0])


def custom_loss_ref(predictions, labels):
    """Pure-JAX reference mirroring the torch forward exactly (incl. the eps)."""
    bsz = predictions.shape[0]
    p0 = predictions[:, 0, :].astype(jnp.float32)               # (B, P)
    xs = (jnp.arange(NUM_X, dtype=jnp.float32) + 0.5) * jnp.float32(1.0 / NUM_X)
    ys = (jnp.arange(NUM_Y, dtype=jnp.float32) + 0.5) * jnp.float32(1.0 / NUM_Y)
    dp_x = jnp.repeat(xs, NUM_Y)                                # (P,) x-major
    dp_y = jnp.tile(ys, NUM_X)                                  # (P,)
    labels = labels.astype(jnp.float32).reshape(bsz, 2)

    conf = jnp.exp(p0) / (jnp.exp(p0) + jnp.exp(1.0 - p0))
    pos_log = -jnp.log(conf + EPS)
    neg_log = -jnp.log(1.0 - conf + EPS)

    total = jnp.float32(0.0)
    for j in range(bsz):
        dist = jnp.abs(dp_x - labels[j, 0]) + jnp.abs(dp_y - labels[j, 1])
        pos_mask = (dist <= MIN_DIST).astype(jnp.float32)
        neg_mask = (dist > MIN_DIST).astype(jnp.float32)        # == torch topk set
        num_pos = jnp.sum(pos_mask)
        num_neg = jnp.float32(P) - num_pos
        loss_conf = (jnp.sum(pos_log * pos_mask) / num_pos
                     + POS_NEG_WEIGHT * jnp.sum(neg_log * neg_mask) / num_neg)
        total = total + loss_conf / jnp.float32(bsz)
    return total


if __name__ == "__main__":
    key = jax.random.PRNGKey(0)
    k_pred, k_lab = jax.random.split(key)

    B = 2
    predictions = jax.random.normal(k_pred, (B, 3, P), dtype=jnp.float32)
    # Labels well inside the anchor grid so num_pos >= 1 (matches torch's
    # implicit assumption — it would otherwise divide by zero).
    labels = jax.random.uniform(k_lab, (B, 1, 2), minval=0.1, maxval=0.9,
                                dtype=jnp.float32)

    loss_fn = jax.jit(custom_loss_pallas)
    loss = jax.block_until_ready(loss_fn(predictions, labels))
    ref = jax.block_until_ready(custom_loss_ref(predictions, labels))

    assert bool(jnp.isfinite(loss)), f"non-finite loss: {loss}"
    # softplus identity (eps dropped) + different reduction order: ~1e-6 diff.
    assert bool(jnp.allclose(loss, ref, rtol=1e-5, atol=1e-4)), (loss, ref)
    print("KERNEL_OK")
</pallas_src>

<mosaic_0001>
module attributes {stable_mosaic.version = 11 : i64} {
  func.func @stage2_kernel(%arg0: i32, %arg1: memref<1x1600xf32, #tpu.memory_space<vmem>>, %arg2: memref<1x1600xf32, #tpu.memory_space<vmem>>, %arg3: memref<2x2xf32, #tpu.memory_space<vmem>>, %arg4: memref<1x128xf32, #tpu.memory_space<vmem>>) attributes {dimension_semantics = [#tpu.dimension_semantics<parallel>], iteration_bounds = array<i64: 1>, scalar_prefetch = 0 : i64, scratch_operands = 0 : i64, tpu.core_type = #tpu.core_type<tc>, window_params = [{pipeline_mode = #tpu.pipeline_mode<synchronous>, transform_indices = @transform_0, window_bounds = array<i64: 1, 1600>}, {pipeline_mode = #tpu.pipeline_mode<synchronous>, transform_indices = @transform_1, window_bounds = array<i64: 1, 1600>}, {transform_indices = @transform_2, window_bounds = array<i64: 2, 2>}, {transform_indices = @transform_3, window_bounds = array<i64: 1, 128>}]} {
    %c0 = arith.constant 0 : index
    %c0_0 = arith.constant 0 : index
    %0 = vector.load %arg1[%c0, %c0_0] : memref<1x1600xf32, #tpu.memory_space<vmem>>, vector<1x1600xf32>
    %c0_1 = arith.constant 0 : index
    %c0_2 = arith.constant 0 : index
    %1 = vector.load %arg2[%c0_1, %c0_2] : memref<1x1600xf32, #tpu.memory_space<vmem>>, vector<1x1600xf32>
    %2 = vector.shape_cast %1 : vector<1x1600xf32> to vector<1x1x1600xf32>
    %cst = arith.constant dense<0.000000e+00> : vector<1xf32>
    %3 = vector.multi_reduction <add>, %2, %cst [1, 2] : vector<1x1x1600xf32> to vector<1xf32>
    %4 = vector.shape_cast %3 : vector<1xf32> to vector<1x1x1xf32>
    %5 = vector.extract %4[0, 0, 0] : f32 from vector<1x1x1xf32>
    %6 = tpu.iota {dimensions = array<i32: 1>} : vector<1x1600xi32>
    %7 = arith.sitofp %6 : vector<1x1600xi32> to vector<1x1600xf32>
    %cst_3 = arith.constant 5.000000e-01 : f32
    %8 = vector.broadcast %cst_3 : f32 to vector<1x1600xf32>
    %9 = arith.addf %7, %8 : vector<1x1600xf32>
    %cst_4 = arith.constant 2.500000e-02 : f32
    %10 = vector.broadcast %cst_4 : f32 to vector<1x1600xf32>
    %11 = arith.mulf %9, %10 : vector<1x1600xf32>
    %12 = math.floor %11 : vector<1x1600xf32>
    %cst_5 = arith.constant 4.000000e+01 : f32
    %13 = vector.broadcast %cst_5 : f32 to vector<1x1600xf32>
    %14 = arith.mulf %13, %12 : vector<1x1600xf32>
    %15 = arith.subf %7, %14 : vector<1x1600xf32>
    %cst_6 = arith.constant 5.000000e-01 : f32
    %16 = vector.broadcast %cst_6 : f32 to vector<1x1600xf32>
    %17 = arith.addf %12, %16 : vector<1x1600xf32>
    %cst_7 = arith.constant 2.500000e-02 : f32
    %18 = vector.broadcast %cst_7 : f32 to vector<1x1600xf32>
    %19 = arith.mulf %17, %18 : vector<1x1600xf32>
    %cst_8 = arith.constant 5.000000e-01 : f32
    %20 = vector.broadcast %cst_8 : f32 to vector<1x1600xf32>
    %21 = arith.addf %15, %20 : vector<1x1600xf32>
    %cst_9 = arith.constant 2.500000e-02 : f32
    %22 = vector.broadcast %cst_9 : f32 to vector<1x1600xf32>
    %23 = arith.mulf %21, %22 : vector<1x1600xf32>
    %c0_10 = arith.constant 0 : index
    %c0_11 = arith.constant 0 : index
    %24 = vector.load %arg3[%c0_10, %c0_11] : memref<2x2xf32, #tpu.memory_space<vmem>>, vector<2x2xf32>
    %25 = vector.extract_strided_slice %24 {offsets = [0, 0], sizes = [2, 1], strides = [1, 1]} : vector<2x2xf32> to vector<2x1xf32>
    %26 = vector.broadcast %19 : vector<1x1600xf32> to vector<2x1600xf32>
    %27 = vector.broadcast %25 : vector<2x1xf32> to vector<2x1600xf32>
    %28 = arith.subf %26, %27 : vector<2x1600xf32>
    %29 = math.absf %28 : vector<2x1600xf32>
    %30 = vector.extract_strided_slice %24 {offsets = [0, 1], sizes = [2, 1], strides = [1, 1]} : vector<2x2xf32> to vector<2x1xf32>
    %31 = vector.broadcast %23 : vector<1x1600xf32> to vector<2x1600xf32>
    %32 = vector.broadcast %30 : vector<2x1xf32> to vector<2x1600xf32>
    %33 = arith.subf %31, %32 : vector<2x1600xf32>
    %34 = math.absf %33 : vector<2x1600xf32>
    %35 = arith.addf %29, %34 : vector<2x1600xf32>
    %cst_12 = arith.constant 2.500000e-02 : f32
    %36 = vector.broadcast %cst_12 : f32 to vector<2x1600xf32>
    %37 = arith.cmpf ole, %35, %36 : vector<2x1600xf32>
    %38 = arith.extui %37 : vector<2x1600xi1> to vector<2x1600xi32>
    %39 = arith.sitofp %38 : vector<2x1600xi32> to vector<2x1600xf32>
    %cst_13 = arith.constant dense<0.000000e+00> : vector<2xf32>
    %40 = vector.multi_reduction <add>, %39, %cst_13 [1] : vector<2x1600xf32> to vector<2xf32>
    %41 = vector.shape_cast %40 : vector<2xf32> to vector<2x1xf32>
    %42 = vector.broadcast %0 : vector<1x1600xf32> to vector<2x1600xf32>
    %43 = arith.mulf %42, %39 : vector<2x1600xf32>
    %cst_14 = arith.constant dense<0.000000e+00> : vector<2xf32>
    %44 = vector.multi_reduction <add>, %43, %cst_14 [1] : vector<2x1600xf32> to vector<2xf32>
    %45 = vector.shape_cast %44 : vector<2xf32> to vector<2x1xf32>
    %46 = vector.broadcast %1 : vector<1x1600xf32> to vector<2x1600xf32>
    %47 = arith.mulf %46, %39 : vector<2x1600xf32>
    %cst_15 = arith.constant dense<0.000000e+00> : vector<2xf32>
    %48 = vector.multi_reduction <add>, %47, %cst_15 [1] : vector<2x1600xf32> to vector<2xf32>
    %49 = vector.shape_cast %48 : vector<2xf32> to vector<2x1xf32>
    %50 = vector.broadcast %5 : f32 to vector<2x1xf32>
    %51 = arith.subf %50, %49 : vector<2x1xf32>
    %cst_16 = arith.constant 1.600000e+03 : f32
    %52 = vector.broadcast %cst_16 : f32 to vector<2x1xf32>
    %53 = arith.subf %52, %41 : vector<2x1xf32>
    %54 = arith.divf %45, %41 : vector<2x1xf32>
    %cst_17 = arith.constant 3.000000e+00 : f32
    %55 = vector.broadcast %cst_17 : f32 to vector<2x1xf32>
    %56 = arith.mulf %55, %51 : vector<2x1xf32>
    %57 = arith.divf %56, %53 : vector<2x1xf32>
    %58 = arith.addf %54, %57 : vector<2x1xf32>
    %59 = vector.shape_cast %58 : vector<2x1xf32> to vector<1x2x1xf32>
    %cst_18 = arith.constant dense<0.000000e+00> : vector<1xf32>
    %60 = vector.multi_reduction <add>, %59, %cst_18 [1, 2] : vector<1x2x1xf32> to vector<1xf32>
    %61 = vector.shape_cast %60 : vector<1xf32> to vector<1x1x1xf32>
    %62 = vector.extract %61[0, 0, 0] : f32 from vector<1x1x1xf32>
    %cst_19 = arith.constant 2.000000e+00 : f32
    %63 = arith.divf %62, %cst_19 : f32
    %64 = vector.broadcast %63 : f32 to vector<1x128xf32>
    %c0_20 = arith.constant 0 : index
    %c0_21 = arith.constant 0 : index
    %65 = vector.load %arg4[%c0_20, %c0_21] : memref<1x128xf32, #tpu.memory_space<vmem>>, vector<1x128xf32>
    tpu.vector_store %arg4[%c0_20, %c0_21], %64 {strides = array<i32>} : memref<1x128xf32, #tpu.memory_space<vmem>>, vector<1x128xf32>,
    return
  }
  func.func @transform_0(%arg0: i32) -> (i32, i32) {
    %c0_i32 = arith.constant 0 : i32
    %c0_i32_0 = arith.constant 0 : i32
    %c0_i32_1 = arith.constant 0 : i32
    return %c0_i32, %c0_i32_0 : i32, i32
  }
  func.func @transform_1(%arg0: i32) -> (i32, i32) {
    %c0_i32 = arith.constant 0 : i32
    %c0_i32_0 = arith.constant 0 : i32
    %c0_i32_1 = arith.constant 0 : i32
    return %c0_i32, %c0_i32_0 : i32, i32
  }
  func.func @transform_2(%arg0: i32) -> (i32, i32) {
    %c0_i32 = arith.constant 0 : i32
    %c0_i32_0 = arith.constant 0 : i32
    return %arg0, %c0_i32 : i32, i32
  }
  func.func @transform_3(%arg0: i32) -> (i32, i32) {
    %c0_i32 = arith.constant 0 : i32
    %c0_i32_0 = arith.constant 0 : i32
    return %c0_i32, %arg0 : i32, i32
  }
}

module attributes {stable_mosaic.version = 11 : i64} {
  func.func @stage1_kernel(%arg0: i32, %arg1: memref<2x1664xf32, #tpu.memory_space<vmem>>, %arg2: memref<1x1x1600xf32, #tpu.memory_space<vmem>>, %arg3: memref<1x1x1600xf32, #tpu.memory_space<vmem>>) attributes {dimension_semantics = [#tpu.dimension_semantics<parallel>], iteration_bounds = array<i64: 1>, scalar_prefetch = 0 : i64, scratch_operands = 0 : i64, tpu.core_type = #tpu.core_type<tc>, window_params = [{transform_indices = @transform_0, window_bounds = array<i64: 2, 1664>}, {transform_indices = @transform_1, window_bounds = array<i64: 1, 1, 1600>}, {transform_indices = @transform_2, window_bounds = array<i64: 1, 1, 1600>}]} {
    %c0 = arith.constant 0 : index
    %c0_0 = arith.constant 0 : index
    %0 = vector.load %arg1[%c0, %c0_0] : memref<2x1664xf32, #tpu.memory_space<vmem>>, vector<2x1600xf32>
    %cst = arith.constant 2.000000e+00 : f32
    %1 = vector.broadcast %cst : f32 to vector<2x1600xf32>
    %2 = arith.mulf %1, %0 : vector<2x1600xf32>
    %cst_1 = arith.constant 1.000000e+00 : f32
    %3 = vector.broadcast %cst_1 : f32 to vector<2x1600xf32>
    %4 = arith.subf %2, %3 : vector<2x1600xf32>
    %5 = math.absf %4 : vector<2x1600xf32>
    %cst_2 = arith.constant 0.000000e+00 : f32
    %6 = vector.broadcast %cst_2 : f32 to vector<2x1600xf32>
    %7 = arith.subf %6, %5 : vector<2x1600xf32>
    %8 = math.exp %7 : vector<2x1600xf32>
    %cst_3 = arith.constant 1.000000e+00 : f32
    %9 = vector.broadcast %cst_3 : f32 to vector<2x1600xf32>
    %10 = arith.addf %9, %8 : vector<2x1600xf32>
    %11 = math.log %10 : vector<2x1600xf32>
    %cst_4 = arith.constant 0.000000e+00 : f32
    %12 = vector.broadcast %cst_4 : f32 to vector<2x1600xf32>
    %13 = arith.subf %12, %4 : vector<2x1600xf32>
    %cst_5 = arith.constant 0.000000e+00 : f32
    %14 = vector.broadcast %cst_5 : f32 to vector<2x1600xf32>
    %15 = arith.maximumf %13, %14 : vector<2x1600xf32>
    %16 = arith.addf %15, %11 : vector<2x1600xf32>
    %17 = arith.addf %16, %4 : vector<2x1600xf32>
    %cst_6 = arith.constant dense<0.000000e+00> : vector<1600xf32>
    %18 = vector.multi_reduction <add>, %16, %cst_6 [0] : vector<2x1600xf32> to vector<1600xf32>
    %19 = vector.shape_cast %18 : vector<1600xf32> to vector<1x1600xf32>
    %20 = vector.shape_cast %19 : vector<1x1600xf32> to vector<1x1x1600xf32>
    %c0_7 = arith.constant 0 : index
    %c0_8 = arith.constant 0 : index
    %c0_9 = arith.constant 0 : index
    %21 = vector.load %arg2[%c0_7, %c0_8, %c0_9] : memref<1x1x1600xf32, #tpu.memory_space<vmem>>, vector<1x1x1600xf32>
    tpu.vector_store %arg2[%c0_7, %c0_8, %c0_9], %20 {strides = array<i32>} : memref<1x1x1600xf32, #tpu.memory_space<vmem>>, vector<1x1x1600xf32>,
    %cst_10 = arith.constant dense<0.000000e+00> : vector<1600xf32>
    %22 = vector.multi_reduction <add>, %17, %cst_10 [0] : vector<2x1600xf32> to vector<1600xf32>
    %23 = vector.shape_cast %22 : vector<1600xf32> to vector<1x1600xf32>
    %24 = vector.shape_cast %23 : vector<1x1600xf32> to vector<1x1x1600xf32>
    %c0_11 = arith.constant 0 : index
    %c0_12 = arith.constant 0 : index
    %c0_13 = arith.constant 0 : index
    %25 = vector.load %arg3[%c0_11, %c0_12, %c0_13] : memref<1x1x1600xf32, #tpu.memory_space<vmem>>, vector<1x1x1600xf32>
    tpu.vector_store %arg3[%c0_11, %c0_12, %c0_13], %24 {strides = array<i32>} : memref<1x1x1600xf32, #tpu.memory_space<vmem>>, vector<1x1x1600xf32>,
    return
  }
  func.func @transform_0(%arg0: i32) -> (i32, i32) {
    %c0_i32 = arith.constant 0 : i32
    %c0_i32_0 = arith.constant 0 : i32
    return %arg0, %c0_i32 : i32, i32
  }
  func.func @transform_1(%arg0: i32) -> (i32, i32, i32) {
    %c0_i32 = arith.constant 0 : i32
    %c0_i32_0 = arith.constant 0 : i32
    %c0_i32_1 = arith.constant 0 : i32
    return %arg0, %c0_i32, %c0_i32_0 : i32, i32, i32
  }
  func.func @transform_2(%arg0: i32) -> (i32, i32, i32) {
    %c0_i32 = arith.constant 0 : i32
    %c0_i32_0 = arith.constant 0 : i32
    %c0_i32_1 = arith.constant 0 : i32
    return %arg0, %c0_i32, %c0_i32_0 : i32, i32, i32
  }
}

</mosaic_0001>

<bundles_post_ra>
// kernel: custom_loss_pallas.2
= control target key start
LH: loop header
LB: loop body
LE: loop exit
PB: predicated region body
PF: predicated region fallthrough
CT: control target
= control target key end

     0   :  { %v644_v32 = vmov 1983009808   ;;  %v74_v34 = vlaneseq  ;;  %v645_v37 = vmov 1966171168   ;;  %vm141_vm0 = vcmask 1041408   ;;  %s824_s0 = inlined_call_operand.vmem [shape: f32[2,4800], index: 0, kind: input, shape index: {}]   ;;  %s825_s1 = inlined_call_operand.vmem [shape: f32[1,1,1600], index: 1, kind: output, shape index: {0}]   ;;  %s826_s2 = inlined_call_operand.vmem [shape: f32[1,1,1600], index: 2, kind: output, shape index: {1}]  }
   0x1   :  { %v10_v0 = vld [vmem:[%s824_s0] sm:$0xff]  ;;  %v11_v1 = vld [vmem:[%s824_s0 + $0x8] sm:$0xff]  ;;  %v12_v2 = vld [vmem:[%s824_s0 + $0x10] sm:$0xff]  ;;  %v72_v33 = vunpack.c.l.s4 %v644_v32  ;;  %v252_v38 = vunpack.c.l.s4 %v645_v37  ;;  %vm226_vm1 = vcmask 517120  }
   0x2   :  { %v13_v3 = vld [vmem:[%s824_s0 + $0x18] sm:$0x3]  ;;  %v14_v4 = vmul.f32 2.0, %v10_v0  ;;  %v15_v5 = vmul.f32 2.0, %v11_v1  ;;  %v16_v6 = vmul.f32 2.0, %v12_v2  ;;  %v75_v41 = vshrl.u32 %v74_v34, 7 }
   0x3   :  { %v17_v7 = vmul.f32 2.0, %v13_v3  ;;  %v73_v40 = vunpack.c.0.s8 %v72_v33  ;;  %v253_v46 = vunpack.c.0.s8 %v252_v38  ;;  %vm752_vm2 = vcmp.lt.s32.totalorder %v74_v34, 576 }
   0x4   :  { %v622_v8 = vadd.f32 -1.0, %v14_v4  ;;  %v673_v9 = vadd.f32 -1.0, %v15_v5  ;;  %v675_v10 = vadd.f32 -1.0, %v16_v6 }
   0x5   :  { %v677_v11 = vadd.f32 -1.0, %v17_v7  ;;  %v686_v50 = vsub.s32 %v73_v40, %v75_v41  ;;  %v688_v59 = vsub.s32 %v253_v46, %v75_v41 }
   0x6   :  { %v22_v12 = vand.u32 2147483647, %v622_v8  ;;  %v23_v13 = vand.u32 2147483647, %v673_v9  ;;  %v24_v14 = vand.u32 2147483647, %v675_v10 }
   0x7   :  { %v25_v15 = vand.u32 2147483647, %v677_v11  ;;  %v50_v35 = vsub.f32 0.0, %v622_v8  ;;  %v51_v36 = vsub.f32 0.0, %v673_v9  ;;  %v52_v39 = vsub.f32 0.0, %v675_v10 }
   0x8   :  { %v26_v16 = vsub.f32 0.0, %v22_v12  ;;  %v27_v17 = vsub.f32 0.0, %v23_v13  ;;  %v28_v18 = vsub.f32 0.0, %v24_v14  ;;  %v53_v42 = vsub.f32 0.0, %v677_v11 }
   0x9   :  { %v29_v19 = vsub.f32 0.0, %v25_v15  ;;  %v54_v43 = vmax.f32 %v50_v35, 0.0  ;;  %v55_v45 = vmax.f32 %v51_v36, 0.0  ;;  %v56_v49 = vmax.f32 %v52_v39, 0.0 }
   0xa   :  { %v30_v20 = vmul.f32 1.442695, %v26_v16  ;;  %v32_v21 = vmul.f32 1.442695, %v27_v17  ;;  %v34_v22 = vmul.f32 1.442695, %v28_v18 }
   0xb   :  { %v36_v23 = vmul.f32 1.442695, %v29_v19  ;;  %v57_v53 = vmax.f32 %v53_v42, 0.0 }
   0xc   :  { %628 = vpow2.f32 %v30_v20 }
   0xd   :  { %630 = vpow2.f32 %v32_v21 }
   0xe   :  { %632 = vpow2.f32 %v34_v22 }
   0xf   :  { %634 = vpow2.f32 %v36_v23 }
  0x16   :  { %v629_v24 = vpop.eup %628 }
  0x17   :  { %v631_v25 = vpop.eup %630  ;;  %v38_v26 = vadd.f32 1.0, %v629_v24 }
  0x18   :  { %v633_v27 = vpop.eup %632  ;;  %v39_v28 = vadd.f32 1.0, %v631_v25 }
  0x19   :  { %v635_v29 = vpop.eup %634  ;;  %v40_v30 = vadd.f32 1.0, %v633_v27  ;;  %636 = vlog2.f32 %v38_v26 }
  0x1a   :  { %v41_v31 = vadd.f32 1.0, %v635_v29  ;;  %638 = vlog2.f32 %v39_v28 }
  0x1b   :  { %640 = vlog2.f32 %v40_v30 }
  0x1c   :  { %642 = vlog2.f32 %v41_v31 }
  0x23   :  { %v637_v44 = vpop.eup %636 }
  0x24   :  { %v639_v47 = vpop.eup %638  ;;  %v43_v48 = vmul.f32 0.6931472, %v637_v44 }
  0x25   :  { %v641_v51 = vpop.eup %640  ;;  %v45_v52 = vmul.f32 0.6931472, %v639_v47 }
  0x26   :  { %v643_v54 = vpop.eup %642  ;;  %v47_v55 = vmul.f32 0.6931472, %v641_v51  ;;  %v58_v56 = vadd.f32 %v54_v43, %v43_v48 }
  0x27   :  { %v49_v57 = vmul.f32 0.6931472, %v643_v54  ;;  %v59_v58 = vadd.f32 %v55_v45, %v45_v52 }
  0x28   :  { %v60_v60 = vadd.f32 %v56_v49, %v47_v55  ;;  %v690_v61 = vadd.f32 %v622_v8, %v58_v56  ;;  %v70_v62 = vcombine.high %v58_v56, %v58_v56  ;;  %v77_v63 = vrot.slane %v58_v56, %v686_v50 }
  0x29   :  { %v693_v0 = vadd.f32 %v57_v53, %v49_v57  ;;  %v696_v1 = vadd.f32 %v673_v9, %v59_v58  ;;  %v87_v2 = vcombine.high %v59_v58, %v59_v58  ;;  %v94_v3 = vrot.slane %v59_v58, %v686_v50 }
  0x2a   :  { %v700_v4 = vadd.f32 %v675_v10, %v60_v60  ;;  %v84_v5 = vrot.slane %v70_v62, %v686_v50  ;;  %v85_v6 = vcombine.high %v77_v63, %v77_v63  ;;  %v104_v7 = vcombine.high %v60_v60, %v60_v60 }
  0x2b   :  { %v705_v8 = vadd.f32 %v677_v11, %v693_v0  ;;  %v101_v12 = vrot.slane %v87_v2, %v686_v50  ;;  %v102_v13 = vcombine.high %v94_v3, %v94_v3  ;;  %v709_v9 = vrot.slane %v60_v60, %v686_v50 }
  0x2c   :  { %v86_v14 = vcombine.high %v84_v5, %v84_v5  ;;  %v712_v15 = vrot.slane %v104_v7, %v686_v50  ;;  %v127_v10 = vrot.slane %v693_v0, %v686_v50  ;;  %v142_v16 = vsel %vm141_vm0, %v77_v63, 0.0 }
  0x2d   :  { %v103_v17 = vcombine.high %v101_v12, %v101_v12  ;;  %v119_v11 = vcombine.high %v709_v9, %v709_v9  ;;  %v143_v18 = vrot.slane %v142_v16, 4  ;;  %v149_v19 = vsel %vm141_vm0, %v85_v6, 0.0 }
  0x2e   :  { %v120_v20 = vcombine.high %v712_v15, %v712_v15  ;;  %v150_v21 = vrot.slane %v149_v19, 4  ;;  %v156_v22 = vsel %vm141_vm0, %v84_v5, 0.0  ;;  %v163_v23 = vsel %vm141_vm0, %v86_v14, 0.0 }
  0x2f   :  { %v144_v24 = vadd.f32 %v143_v18, %v142_v16  ;;  %v157_v25 = vrot.slane %v156_v22, 4  ;;  %v164_v26 = vrot.slane %v163_v23, 4  ;;  %v170_v27 = vsel %vm141_vm0, %v94_v3, 0.0 }
  0x30   :  { %v151_v28 = vadd.f32 %v150_v21, %v149_v19  ;;  %v171_v29 = vrot.slane %v170_v27, 4  ;;  %v177_v30 = vsel %vm141_vm0, %v102_v13, 0.0  ;;  %v184_v31 = vsel %vm141_vm0, %v101_v12, 0.0 }
  0x31   :  { %v145_v32 = vrot.slane %v144_v24, 2  ;;  %v158_v33 = vadd.f32 %v157_v25, %v156_v22  ;;  %v165_v35 = vadd.f32 %v164_v26, %v163_v23  ;;  %v178_v36 = vrot.slane %v177_v30, 4 }
  0x32   :  { %v152_v37 = vrot.slane %v151_v28, 2  ;;  %v172_v38 = vadd.f32 %v171_v29, %v170_v27  ;;  %v185_v39 = vrot.slane %v184_v31, 4  ;;  %v191_v40 = vsel %vm141_vm0, %v103_v17, 0.0 }
  0x33   :  { %v146_v41 = vadd.f32 %v145_v32, %v144_v24  ;;  %v159_v42 = vrot.slane %v158_v33, 2  ;;  %v166_v43 = vrot.slane %v165_v35, 2  ;;  %v179_v44 = vadd.f32 %v178_v36, %v177_v30 }
  0x34   :  { %v153_v45 = vadd.f32 %v152_v37, %v151_v28  ;;  %v173_v46 = vrot.slane %v172_v38, 2  ;;  %v186_v47 = vadd.f32 %v185_v39, %v184_v31  ;;  %v192_v48 = vrot.slane %v191_v40, 4 }
  0x35   :  { %v147_v49 = vrot.slane %v146_v41, 1  ;;  %v160_v51 = vadd.f32 %v159_v42, %v158_v33  ;;  %v167_v52 = vadd.f32 %v166_v43, %v165_v35  ;;  %v180_v53 = vrot.slane %v179_v44, 2 }
  0x36   :  { %v154_v54 = vrot.slane %v153_v45, 1  ;;  %v174_v55 = vadd.f32 %v173_v46, %v172_v38  ;;  %v187_v56 = vrot.slane %v186_v47, 2  ;;  %v193_v57 = vadd.f32 %v192_v48, %v191_v40 }
  0x37   :  { %v148_v58 = vadd.f32 %v147_v49, %v146_v41  ;;  %v161_v60 = vrot.slane %v160_v51, 1  ;;  %v168_v62 = vrot.slane %v167_v52, 1  ;;  %v181_v63 = vadd.f32 %v180_v53, %v179_v44 }
  0x38   :  { %v155_v2 = vadd.f32 %v154_v54, %v153_v45  ;;  %v175_v3 = vrot.slane %v174_v55, 1  ;;  %v188_v5 = vadd.f32 %v187_v56, %v186_v47  ;;  %v194_v6 = vrot.slane %v193_v57, 2 }
  0x39   :  { %v162_v7 = vadd.f32 %v161_v60, %v160_v51  ;;  %v169_v12 = vadd.f32 %v168_v62, %v167_v52  ;;  %v182_v13 = vrot.slane %v181_v63, 1  ;;  %v198_v14 = vsel %vm141_vm0, %v709_v9, 0.0 }
  0x3a   :  { %v176_v16 = vadd.f32 %v175_v3, %v174_v55  ;;  %v189_v17 = vrot.slane %v188_v5, 1  ;;  %v195_v18 = vadd.f32 %v194_v6, %v193_v57  ;;  %v199_v19 = vrot.slane %v198_v14, 4 }
  0x3b   :  { %v183_v21 = vadd.f32 %v182_v13, %v181_v63  ;;  %v205_v22 = vsel %vm141_vm0, %v119_v11, 0.0  ;;  %v212_v23 = vsel %vm141_vm0, %v712_v15, 0.0  ;;  %v219_v24 = vsel %vm141_vm0, %v120_v20, 0.0 }
  0x3c   :  { %v190_v25 = vadd.f32 %v189_v17, %v188_v5  ;;  %v196_v26 = vrot.slane %v195_v18, 1  ;;  %v200_v27 = vadd.f32 %v199_v19, %v198_v14  ;;  %v206_v28 = vrot.slane %v205_v22, 4 }
  0x3d   :  { %v213_v29 = vrot.slane %v212_v23, 4  ;;  %v220_v30 = vrot.slane %v219_v24, 4  ;;  %v227_v9 = vsel %vm226_vm1, %v127_v10, 0.0  ;;  %v247_v31 = vcombine.low %v148_v58, %v155_v2 }
  0x3e   :  { %v197_v32 = vadd.f32 %v196_v26, %v195_v18  ;;  %v201_v33 = vrot.slane %v200_v27, 2  ;;  %v207_v11 = vadd.f32 %v206_v28, %v205_v22  ;;  %v228_v35 = vrot.slane %v227_v9, 4 }
  0x3f   :  { %v214_v36 = vadd.f32 %v213_v29, %v212_v23  ;;  %v221_v15 = vadd.f32 %v220_v30, %v219_v24  ;;  %v248_v37 = vcombine.low %v162_v7, %v169_v12  ;;  %v249_v20 = vcombine.low %v176_v16, %v183_v21 }
  0x40   :  { %v202_v38 = vadd.f32 %v201_v33, %v200_v27  ;;  %v208_v39 = vrot.slane %v207_v11, 2  ;;  %v229_v40 = vadd.f32 %v228_v35, %v227_v9  ;;  %v250_v41 = vcombine.low %v190_v25, %v197_v32 }
  0x41   :  { %v215_v42 = vrot.slane %v214_v36, 2  ;;  %v222_v43 = vrot.slane %v221_v15, 2  ;;  %v257_v44 = vrot.slane %v247_v31, %v688_v59  ;;  %v264_v0 = vrot.slane %v248_v37, %v688_v59 }
  0x42   :  { %v203_v10 = vrot.slane %v202_v38, 1  ;;  %v209_v45 = vadd.f32 %v208_v39, %v207_v11  ;;  %v230_v46 = vrot.slane %v229_v40, 2  ;;  %v271_v47 = vrot.slane %v249_v20, %v688_v59 }
  0x43   :  { %v216_v48 = vadd.f32 %v215_v42, %v214_v36  ;;  %v223_v49 = vadd.f32 %v222_v43, %v221_v15  ;;  %v278_v51 = vrot.slane %v250_v41, %v688_v59  ;;  %v279_v52 = vcombine.low %v257_v44, %v264_v0 }
  0x44   :  { %v204_v53 = vadd.f32 %v203_v10, %v202_v38  ;;  %v210_v54 = vrot.slane %v209_v45, 1  ;;  %v231_v55 = vadd.f32 %v230_v46, %v229_v40  ;;  %v347_v56 = vcombine.high %v690_v61, %v690_v61 }
  0x45   :  { %v217_v57 = vrot.slane %v216_v48, 1  ;;  %v224_v58 = vrot.slane %v223_v49, 1  ;;  %v280_v60 = vcombine.low %v271_v47, %v278_v51  ;;  %v287_v62 = vrot.slane %v279_v52, %v688_v59 }
  0x46   :  { %v211_v63 = vadd.f32 %v210_v54, %v209_v45  ;;  %v232_v2 = vrot.slane %v231_v55, 1  ;;  %v354_v3 = vrot.slane %v690_v61, %v686_v50  ;;  %v361_v5 = vrot.slane %v347_v56, %v686_v50 }
  0x47   :  { %v218_v6 = vadd.f32 %v217_v57, %v216_v48  ;;  %v225_v7 = vadd.f32 %v224_v58, %v223_v49  ;;  %v294_v12 = vrot.slane %v280_v60, %v688_v59  ;;  %v364_v13 = vcombine.high %v696_v1, %v696_v1 }
  0x48   :  { %v233_v14 = vadd.f32 %v232_v2, %v231_v55  ;;  %v296_v16 = vcombine.low %v204_v53, %v211_v63  ;;  %v362_v18 = vcombine.high %v354_v3, %v354_v3  ;;  %v363_v19 = vcombine.high %v361_v5, %v361_v5 }
  0x49   :  { %v295_v21 = vcombine.low %v287_v62, %v294_v12  ;;  %v297_v61 = vcombine.low %v218_v6, %v225_v7  ;;  %v371_v22 = vrot.slane %v696_v1, %v686_v50  ;;  %v378_v23 = vrot.slane %v364_v13, %v686_v50 }
  0x4a   :  { %v304_v24 = vrot.slane %v296_v16, %v688_v59  ;;  %v318_v25 = vrot.slane %v233_v14, %v688_v59  ;;  %v381_v26 = vcombine.high %v700_v4, %v700_v4  ;;  %v765_v34 = vrot.slane %v700_v4, %v686_v50 }
  0x4b   :  { %v311_v27 = vrot.slane %v297_v61, %v688_v59  ;;  %337 = vst [vmem:[%s825_s1] sm:$0xff] %v295_v21  ;;  %v379_v1 = vcombine.high %v371_v22, %v371_v22  ;;  %v380_v28 = vcombine.high %v378_v23, %v378_v23  ;;  %v404_v29 = vrot.slane %v705_v8, %v686_v50 }
  0x4c   :  { %v333_v30 = vrot.slane %v318_v25, %v688_v59  ;;  %v775_v9 = vrot.slane %v381_v26, %v686_v50  ;;  %v396_v4 = vcombine.high %v765_v34, %v765_v34  ;;  %v418_v31 = vsel %vm141_vm0, %v354_v3, 0.0 }
  0x4d   :  { %v319_v32 = vcombine.low %v304_v24, %v311_v27  ;;  %v419_v33 = vrot.slane %v418_v31, 4  ;;  %v425_v11 = vsel %vm141_vm0, %v362_v18, 0.0  ;;  %v432_v35 = vsel %vm141_vm0, %v361_v5, 0.0 }
  0x4e   :  { %v397_v36 = vcombine.high %v775_v9, %v775_v9  ;;  %v426_v15 = vrot.slane %v425_v11, 4  ;;  %v433_v37 = vrot.slane %v432_v35, 4  ;;  %v439_v20 = vsel %vm141_vm0, %v363_v19, 0.0 }
  0x4f   :  { %v326_v38 = vrot.slane %v319_v32, %v688_v59  ;;  %v420_v39 = vadd.f32 %v419_v33, %v418_v31  ;;  %v440_v40 = vrot.slane %v439_v20, 4  ;;  %v446_v41 = vsel %vm141_vm0, %v371_v22, 0.0 }
  0x50   :  { %v427_v42 = vadd.f32 %v426_v15, %v425_v11  ;;  %v434_v43 = vadd.f32 %v433_v37, %v432_v35  ;;  %v447_v44 = vrot.slane %v446_v41, 4  ;;  %v453_v0 = vsel %vm141_vm0, %v379_v1, 0.0 }
  0x51   :  { %v334_v10 = vcombine.low %v326_v38, %v333_v30  ;;  %v421_v45 = vrot.slane %v420_v39, 2  ;;  %v441_v46 = vadd.f32 %v440_v40, %v439_v20  ;;  %v454_v47 = vrot.slane %v453_v0, 4 }
  0x52   :  { %v428_v48 = vrot.slane %v427_v42, 2  ;;  %v435_v49 = vrot.slane %v434_v43, 2  ;;  %v448_v51 = vadd.f32 %v447_v44, %v446_v41  ;;  %v460_v52 = vsel %vm141_vm0, %v378_v23, 0.0 }
  0x53   :  { %342 = vst.msk [vmem:[%s825_s1 + $0x8] sm:$0x1f] %vm752_vm2, %v334_v10  ;;  %v422_v53 = vadd.f32 %v421_v45, %v420_v39  ;;  %v442_v54 = vrot.slane %v441_v46, 2  ;;  %v455_v55 = vadd.f32 %v454_v47, %v453_v0  ;;  %v461_v56 = vrot.slane %v460_v52, 4 }
  0x54   :  { %v429_v57 = vadd.f32 %v428_v48, %v427_v42  ;;  %v436_v58 = vadd.f32 %v435_v49, %v434_v43  ;;  %v449_v60 = vrot.slane %v448_v51, 2  ;;  %v467_v62 = vsel %vm141_vm0, %v380_v28, 0.0 }
  0x55   :  { %v423_v63 = vrot.slane %v422_v53, 1  ;;  %v443_v2 = vadd.f32 %v442_v54, %v441_v46  ;;  %v456_v3 = vrot.slane %v455_v55, 2  ;;  %v462_v5 = vadd.f32 %v461_v56, %v460_v52 }
  0x56   :  { %v430_v6 = vrot.slane %v429_v57, 1  ;;  %v437_v7 = vrot.slane %v436_v58, 1  ;;  %v450_v12 = vadd.f32 %v449_v60, %v448_v51  ;;  %v468_v13 = vrot.slane %v467_v62, 4 }
  0x57   :  { %v424_v14 = vadd.f32 %v423_v63, %v422_v53  ;;  %v444_v16 = vrot.slane %v443_v2, 1  ;;  %v457_v18 = vadd.f32 %v456_v3, %v455_v55  ;;  %v463_v19 = vrot.slane %v462_v5, 2 }
  0x58   :  { %v431_v21 = vadd.f32 %v430_v6, %v429_v57  ;;  %v438_v61 = vadd.f32 %v437_v7, %v436_v58  ;;  %v451_v22 = vrot.slane %v450_v12, 1  ;;  %v469_v23 = vadd.f32 %v468_v13, %v467_v62 }
  0x59   :  { %v445_v24 = vadd.f32 %v444_v16, %v443_v2  ;;  %v458_v25 = vrot.slane %v457_v18, 1  ;;  %v464_v26 = vadd.f32 %v463_v19, %v462_v5  ;;  %v474_v27 = vsel %vm141_vm0, %v765_v34, 0.0 }
  0x5a   :  { %v452_v1 = vadd.f32 %v451_v22, %v450_v12  ;;  %v470_v28 = vrot.slane %v469_v23, 2  ;;  %v475_v30 = vrot.slane %v474_v27, 4  ;;  %v481_v31 = vsel %vm141_vm0, %v396_v4, 0.0 }
  0x5b   :  { %v459_v32 = vadd.f32 %v458_v25, %v457_v18  ;;  %v465_v33 = vrot.slane %v464_v26, 1  ;;  %v482_v11 = vrot.slane %v481_v31, 4  ;;  %v488_v35 = vsel %vm141_vm0, %v775_v9, 0.0 }
  0x5c   :  { %v471_v15 = vadd.f32 %v470_v28, %v469_v23  ;;  %v476_v37 = vadd.f32 %v475_v30, %v474_v27  ;;  %v489_v20 = vrot.slane %v488_v35, 4  ;;  %v495_v38 = vsel %vm141_vm0, %v397_v36, 0.0 }
  0x5d   :  { %v466_v39 = vadd.f32 %v465_v33, %v464_v26  ;;  %v483_v40 = vadd.f32 %v482_v11, %v481_v31  ;;  %v496_v41 = vrot.slane %v495_v38, 4  ;;  %v502_v34 = vsel %vm226_vm1, %v404_v29, 0.0 }
  0x5e   :  { %v472_v4 = vrot.slane %v471_v15, 1  ;;  %v477_v42 = vrot.slane %v476_v37, 2  ;;  %v490_v43 = vadd.f32 %v489_v20, %v488_v35  ;;  %v503_v44 = vrot.slane %v502_v34, 4 }
  0x5f   :  { %v484_v0 = vrot.slane %v483_v40, 2  ;;  %v497_v10 = vadd.f32 %v496_v41, %v495_v38  ;;  %v522_v9 = vcombine.low %v424_v14, %v431_v21  ;;  %v523_v45 = vcombine.low %v438_v61, %v445_v24 }
  0x60   :  { %v473_v46 = vadd.f32 %v472_v4, %v471_v15  ;;  %v478_v47 = vadd.f32 %v477_v42, %v476_v37  ;;  %v491_v48 = vrot.slane %v490_v43, 2  ;;  %v504_v36 = vadd.f32 %v503_v44, %v502_v34 }
  0x61   :  { %v485_v49 = vadd.f32 %v484_v0, %v483_v40  ;;  %v498_v51 = vrot.slane %v497_v10, 2  ;;  %v524_v52 = vcombine.low %v452_v1, %v459_v32  ;;  %v532_v53 = vrot.slane %v522_v9, %v688_v59 }
  0x62   :  { %v479_v50 = vrot.slane %v478_v47, 1  ;;  %v492_v8 = vadd.f32 %v491_v48, %v490_v43  ;;  %v505_v29 = vrot.slane %v504_v36, 2  ;;  %v525_v54 = vcombine.low %v466_v39, %v473_v46 }
  0x63   :  { %v486_v55 = vrot.slane %v485_v49, 1  ;;  %v499_v56 = vadd.f32 %v498_v51, %v497_v10  ;;  %v539_v57 = vrot.slane %v523_v45, %v688_v59  ;;  %v546_v58 = vrot.slane %v524_v52, %v688_v59 }
  0x64   :  { %v480_v60 = vadd.f32 %v479_v50, %v478_v47  ;;  %v493_v62 = vrot.slane %v492_v8, 1  ;;  %v506_v63 = vadd.f32 %v505_v29, %v504_v36  ;;  %v553_v2 = vrot.slane %v525_v54, %v688_v59 }
  0x65   :  { %v487_v3 = vadd.f32 %v486_v55, %v485_v49  ;;  %v500_v5 = vrot.slane %v499_v56, 1  ;;  %v554_v6 = vcombine.low %v532_v53, %v539_v57 }
  0x66   :  { %v494_v7 = vadd.f32 %v493_v62, %v492_v8  ;;  %v507_v12 = vrot.slane %v506_v63, 1  ;;  %v555_v13 = vcombine.low %v546_v58, %v553_v2 }
  0x67   :  { %v501_v14 = vadd.f32 %v500_v5, %v499_v56  ;;  %v562_v16 = vrot.slane %v554_v6, %v688_v59  ;;  %v571_v18 = vcombine.low %v480_v60, %v487_v3 }
  0x68   :  { %v508_v19 = vadd.f32 %v507_v12, %v506_v63  ;;  %v569_v21 = vrot.slane %v555_v13, %v688_v59 }
  0x69   :  { %v572_v61 = vcombine.low %v494_v7, %v501_v14  ;;  %v579_v22 = vrot.slane %v571_v18, %v688_v59 }
  0x6a   :  { %v570_v23 = vcombine.low %v562_v16, %v569_v21  ;;  %v593_v24 = vrot.slane %v508_v19, %v688_v59 }
  0x6b   :  { %v586_v25 = vrot.slane %v572_v61, %v688_v59 }
  0x6c   :  { %612 = vst [vmem:[%s826_s2] sm:$0xff] %v570_v23  ;;  %v608_v27 = vrot.slane %v593_v24, %v688_v59 }
  0x6d   :  { %v594_v26 = vcombine.low %v579_v22, %v586_v25 }
  0x6f   :  { %v601_v1 = vrot.slane %v594_v26, %v688_v59 }
  0x71   :  { %v609_v28 = vcombine.low %v601_v1, %v608_v27 }
  0x73   :  { %613 = vst.msk [vmem:[%s826_s2 + $0x8] sm:$0x1f] %vm752_vm2, %v609_v28 }

// kernel: custom_loss_pallas.3
= control target key start
LH: loop header
LB: loop body
LE: loop exit
PB: predicated region body
PF: predicated region fallthrough
CT: control target
= control target key end

     0   :  { %v21_v1 = vlaneseq  ;;  %v646_v2 = vmov 0   ;;  %s1083_s0 = inlined_call_operand.vmem [shape: f32[1,1600], index: 0, kind: input, shape index: {}]   ;;  %s1084_s1 = inlined_call_operand.vmem [shape: f32[1,1600], index: 1, kind: input, shape index: {}]   ;;  %s1085_s2 = inlined_call_operand.vmem [shape: f32[2,2], index: 2, kind: input, shape index: {}]   ;;  %s1086_s3 = inlined_call_operand.hbm [shape: f32[1,128], index: 3, kind: output, shape index: {}]  }
   0x1   :  { %v266_v0 = vld [vmem:[%s1085_s2] sm:$0x3]  ;;  %616 = vset.pattern.permute.xlu0 %v646_v2 }
   0x2   :  { %8 = vsyncpa [#allocation3], 0  ;;  %269 = vperm.xlu0 %616, %v266_v0   ;;  %v673_v3 = vshrl.u32 %v21_v1, 7  ;;  %v17_v4 = vld [vmem:[%s1084_s1] sm:$0xff]  ;;  %v647_v10 = vmov 1   ;;  %vm86_vm0 = vcmask 1040384  }
   0x3   :  { %v18_v28 = vld [vmem:[%s1084_s1 + $0x8] sm:$0x1f]  ;;  %vm110_vm1 = vcmask 516096   ;;  %v766_v53 = vand.u32 127, %v21_v1  ;;  %vm380_vm2 = vcmask 1041408   ;;  %s649_s20 = smov [#allocation2]  }
   0x4   :  { %v679_v5 = vsub.s32 0, %v673_v3  ;;  %v682_v6 = vsub.s32 1, %v673_v3  ;;  %v685_v7 = vsub.s32 2, %v673_v3  ;;  %v688_v8 = vsub.s32 3, %v673_v3  ;;  %s587_s21 = sshll.u32 %s649_s20, 4  ;;  %s588_s21 = int_to_ptr.vmem [resolvable:$true] %s587_s21 }
   0x5   :  { %v691_v9 = vsub.s32 4, %v673_v3  ;;  %v1089_v15 = vsub.s32 5, %v673_v3  ;;  %v1088_v16 = vsub.s32 6, %v673_v3  ;;  %v1087_v23 = vsub.s32 7, %v673_v3  ;;  %s622_s24 = scalar_lea.vmem %s588_s21, 16  ;;  %s626_s25 = scalar_lea.vmem %s588_s21, 32 }
   0x6   :  { %617 = vset.pattern.permute.xlu0 %v647_v10  ;;  %v694_v11 = vrot.slane %v17_v4, %v679_v5  ;;  %v697_v12 = vrot.slane %v17_v4, %v682_v6  ;;  %v700_v13 = vrot.slane %v17_v4, %v685_v7  ;;  %v703_v14 = vrot.slane %v17_v4, %v688_v8  ;;  %p623_p0 = scmp.ne.s32.totalorder %s588_s21, %s622_s24  ;;  %p627_p1 = scmp.lt.s32.totalorder %s588_s21, %s588_s21 }
   0x7   :  { %299 = vperm.xlu0 %617, %v266_v0   ;;  %v708_v17 = vrot.slane %v17_v4, %v691_v9  ;;  %v718_v22 = vrot.slane %v17_v4, %v1089_v15  ;;  %v725_v26 = vrot.slane %v17_v4, %v1088_v16  ;;  %v734_v30 = vrot.slane %v17_v4, %v1087_v23  ;;  %p628_p2 = scmp.lt.s32.totalorder %s626_s25, %s622_s24 }
   0x8   :  { %v87_v18 = vsel %vm86_vm0, %v694_v11, 0.0  ;;  %v88_v19 = vsel %vm86_vm0, %v697_v12, 0.0  ;;  %v90_v20 = vsel %vm86_vm0, %v700_v13, 0.0  ;;  %v92_v24 = vsel %vm86_vm0, %v703_v14, 0.0 }
   0x9   :  { %1110 = vst [vmem:[#allocation5_spill] sm:$0xff] %v708_v17  ;;  %v89_v21 = vadd.f32 %v88_v19, %v87_v18  ;;  %1111 = vst [vmem:[#allocation6_spill] sm:$0xff] %v718_v22  ;;  %v94_v27 = vsel %vm86_vm0, %v708_v17, 0.0  ;;  %v96_v31 = vsel %vm86_vm0, %v718_v22, 0.0  ;;  %v739_v33 = vrot.slane %v18_v28, %v679_v5  ;;  %p629_p3 = por %p628_p2, %p627_p1 }
   0xa   :  { %1112 = vst [vmem:[#allocation7_spill] sm:$0xff] %v725_v26  ;;  %1113 = vst [vmem:[#allocation8_spill] sm:$0xff] %v734_v30  ;;  %v98_v34 = vsel %vm86_vm0, %v725_v26, 0.0  ;;  %v744_v36 = vrot.slane %v18_v28, %v682_v6  ;;  %v100_v37 = vsel %vm86_vm0, %v734_v30, 0.0  ;;  %v749_v39 = vrot.slane %v18_v28, %v685_v7 }
   0xb   :  { %v91_v25 = vadd.f32 %v90_v20, %v89_v21  ;;  %1114 = vst [vmem:[#allocation9_spill] sm:$0xff] %v739_v33  ;;  %v102_v40 = vsel %vm86_vm0, %v739_v33, 0.0  ;;  %v754_v42 = vrot.slane %v18_v28, %v688_v8  ;;  %v759_v45 = vrot.slane %v18_v28, %v691_v9  ;;  %p630_p4 = pnand %p629_p3, %p623_p0 }
   0xc   :  { %1115 = vst [vmem:[#allocation10_spill] sm:$0xff] %v744_v36  ;;  %1116 = vst [vmem:[#allocation11_spill] sm:$0xff] %v749_v39  ;;  %v104_v43 = vsel %vm86_vm0, %v744_v36, 0.0  ;;  %v106_v46 = vsel %vm86_vm0, %v749_v39, 0.0  ;;  %v769_v54 = vadd.s32 128, %v766_v53  ;;  %v772_v55 = vadd.s32 256, %v766_v53 }
   0xd   :  { %v93_v29 = vadd.f32 %v92_v24, %v91_v25  ;;  %1117 = vst [vmem:[#allocation12_spill] sm:$0xff] %v754_v42  ;;  %1118 = vst [vmem:[#allocation13_spill] sm:$0xff] %v759_v45  ;;  %v108_v48 = vsel %vm86_vm0, %v754_v42, 0.0  ;;  %v111_v50 = vsel %vm110_vm1, %v759_v45, 0.0  ;;  %v775_v56 = vadd.s32 384, %v766_v53 }
   0xe   :  { %v778_v57 = vadd.s32 512, %v766_v53  ;;  %v781_v58 = vadd.s32 640, %v766_v53  ;;  %v784_v59 = vadd.s32 768, %v766_v53  ;;  %v787_v60 = vadd.s32 896, %v766_v53 }
   0xf   :  { %v95_v32 = vadd.f32 %v94_v27, %v93_v29  ;;  %v790_v61 = vadd.s32 1024, %v766_v53  ;;  %v793_v62 = vadd.s32 1152, %v766_v53  ;;  %v796_v63 = vadd.s32 1280, %v766_v53 }
  0x10   :  { %v799_v0 = vadd.s32 1408, %v766_v53  ;;  %v802_v1 = vadd.s32 1536, %v766_v53  ;;  %v136_v2 = vcvt.s32.f32 %v766_v53  ;;  %v137_v4 = vcvt.s32.f32 %v769_v54 }
  0x11   :  { %v97_v35 = vadd.f32 %v96_v31, %v95_v32  ;;  %v1100_v10 = vcvt.s32.f32 %v772_v55  ;;  %v1098_v18 = vcvt.s32.f32 %v775_v56  ;;  %v1097_v19 = vcvt.s32.f32 %v778_v57 }
  0x12   :  { %v1095_v20 = vcvt.s32.f32 %v781_v58  ;;  %v1092_v21 = vcvt.s32.f32 %v784_v59  ;;  %v1090_v24 = vcvt.s32.f32 %v787_v60  ;;  %v1091_v25 = vcvt.s32.f32 %v790_v61 }
  0x13   :  { %v99_v38 = vadd.f32 %v98_v34, %v97_v35  ;;  %v1093_v27 = vcvt.s32.f32 %v793_v62  ;;  %v1094_v28 = vcvt.s32.f32 %v796_v63  ;;  %v1096_v29 = vcvt.s32.f32 %v799_v0 }
  0x14   :  { %v1099_v31 = vcvt.s32.f32 %v802_v1  ;;  %v149_v32 = vadd.f32 0.5, %v136_v2  ;;  %v150_v34 = vadd.f32 0.5, %v137_v4  ;;  %v151_v35 = vadd.f32 0.5, %v1100_v10 }
  0x15   :  { %v101_v41 = vadd.f32 %v100_v37, %v99_v38  ;;  %v152_v37 = vadd.f32 0.5, %v1098_v18  ;;  %v153_v38 = vadd.f32 0.5, %v1097_v19  ;;  %v1119_v42 = vcvt.s32.f32 %v772_v55 }
  0x16   :  { %v1121_v33 = vcvt.s32.f32 %v778_v57  ;;  %v1123_v22 = vcvt.s32.f32 %v784_v59  ;;  %v1124_v53 = vcvt.s32.f32 %v787_v60  ;;  %v1125_v54 = vcvt.s32.f32 %v790_v61 }
  0x17   :  { %v103_v44 = vadd.f32 %v102_v40, %v101_v41  ;;  %v154_v40 = vadd.f32 0.5, %v1095_v20  ;;  %v155_v41 = vadd.f32 0.5, %v1092_v21  ;;  %v165_v23 = vmul.f32 0.025, %v152_v37 }
  0x18   :  { %v166_v16 = vmul.f32 0.025, %v153_v38  ;;  %vm404_vm0 = vcmask 517120   ;;  %vm565_vm1 = vcmask 1024  }
  0x19   :  { %v105_v47 = vadd.f32 %v104_v43, %v103_v44  ;;  %v156_v43 = vadd.f32 0.5, %v1090_v24  ;;  %v157_v44 = vadd.f32 0.5, %v1091_v25  ;;  %v167_v15 = vmul.f32 0.025, %v154_v40 }
  0x1a   :  { %v168_v24 = vmul.f32 0.025, %v155_v41 }
  0x1b   :  { %v107_v49 = vadd.f32 %v106_v46, %v105_v47  ;;  %v158_v46 = vadd.f32 0.5, %v1093_v27  ;;  %v159_v47 = vadd.f32 0.5, %v1094_v28  ;;  %v169_v25 = vmul.f32 0.025, %v156_v43  ;;  %v846_v27 = vld [vmem:[%s1083_s0] sm:$0xff] }
  0x1c   :  { %v170_v21 = vmul.f32 0.025, %v157_v44  ;;  %v180_v37 = vfloor.f32 %v167_v15  ;;  %v181_v40 = vfloor.f32 %v168_v24  ;;  %v1120_v24 = vcvt.s32.f32 %v775_v56 }
  0x1d   :  { %v109_v51 = vadd.f32 %v108_v48, %v107_v49  ;;  %v160_v48 = vadd.f32 0.5, %v1096_v29  ;;  %v161_v49 = vadd.f32 0.5, %v1099_v31  ;;  %v171_v28 = vmul.f32 0.025, %v158_v46 }
  0x1e   :  { %v172_v20 = vmul.f32 0.025, %v159_v47  ;;  %v182_v41 = vfloor.f32 %v169_v25  ;;  %v183_v43 = vfloor.f32 %v170_v21  ;;  %v193_v10 = vmul.f32 40.0, %v180_v37 }
  0x1f   :  { %v112_v52 = vadd.f32 %v111_v50, %v109_v51  ;;  %v162_v50 = vmul.f32 0.025, %v149_v32  ;;  %v163_v51 = vmul.f32 0.025, %v150_v34  ;;  %v173_v29 = vmul.f32 0.025, %v160_v48 }
  0x20   :  { %v174_v19 = vmul.f32 0.025, %v161_v49  ;;  %v178_v34 = vfloor.f32 %v165_v23  ;;  %v184_v47 = vfloor.f32 %v171_v28  ;;  %v185_v48 = vfloor.f32 %v172_v20 }
  0x21   :  { %113 = vadd.xlane.f32.xlu1 %v112_v52  ;;  %v164_v52 = vmul.f32 0.025, %v151_v35  ;;  %v175_v18 = vfloor.f32 %v162_v50  ;;  %v176_v31 = vfloor.f32 %v163_v51  ;;  %v179_v35 = vfloor.f32 %v166_v16 }
  0x22   :  { %v186_v49 = vfloor.f32 %v173_v29  ;;  %v187_v50 = vfloor.f32 %v174_v19  ;;  %v191_v15 = vmul.f32 40.0, %v178_v34  ;;  %v194_v21 = vmul.f32 40.0, %v181_v40 }
  0x23   :  { %v177_v32 = vfloor.f32 %v164_v52  ;;  %v188_v51 = vmul.f32 40.0, %v175_v18  ;;  %v189_v23 = vmul.f32 40.0, %v176_v31  ;;  %v192_v52 = vmul.f32 40.0, %v179_v35 }
  0x24   :  { %v195_v25 = vmul.f32 40.0, %v182_v41  ;;  %v196_v38 = vmul.f32 40.0, %v183_v43  ;;  %v197_v46 = vmul.f32 40.0, %v184_v47  ;;  %v198_v28 = vmul.f32 40.0, %v185_v48 }
  0x25   :  { %v190_v16 = vmul.f32 40.0, %v177_v32  ;;  %v199_v20 = vmul.f32 40.0, %v186_v49  ;;  %v200_v29 = vmul.f32 40.0, %v187_v50  ;;  %v201_v19 = vsub.f32 %v136_v2, %v188_v51 }
  0x26   :  { %v202_v45 = vsub.f32 %v137_v4, %v189_v23  ;;  %v204_v36 = vsub.f32 %v1120_v24, %v191_v15  ;;  %v205_v30 = vsub.f32 %v1121_v33, %v192_v52  ;;  %v1122_v44 = vcvt.s32.f32 %v781_v58 }
  0x27   :  { %v203_v39 = vsub.f32 %v1119_v42, %v190_v16  ;;  %v207_v17 = vsub.f32 %v1123_v22, %v194_v21  ;;  %v208_v2 = vsub.f32 %v1124_v53, %v195_v25  ;;  %v209_v4 = vsub.f32 %v1125_v54, %v196_v38 }
  0x28   :  { %v206_v26 = vsub.f32 %v1122_v44, %v193_v10  ;;  %v214_v55 = vadd.f32 0.5, %v175_v18  ;;  %v1126_v42 = vcvt.s32.f32 %v793_v62  ;;  %v215_v51 = vadd.f32 0.5, %v176_v31 }
  0x29   :  { %v216_v23 = vadd.f32 0.5, %v177_v32  ;;  %v217_v57 = vadd.f32 0.5, %v178_v34  ;;  %v1127_v33 = vcvt.s32.f32 %v796_v63  ;;  %v218_v10 = vadd.f32 0.5, %v179_v35 }
  0x2a   :  { %v210_v56 = vsub.f32 %v1126_v42, %v197_v46  ;;  %v219_v44 = vadd.f32 0.5, %v180_v37  ;;  %v220_v59 = vadd.f32 0.5, %v181_v40  ;;  %v1128_v22 = vcvt.s32.f32 %v799_v0 }
  0x2b   :  { %v211_v58 = vsub.f32 %v1127_v33, %v198_v28  ;;  %v221_v16 = vadd.f32 0.5, %v182_v41  ;;  %v222_v15 = vadd.f32 0.5, %v183_v43  ;;  %v223_v61 = vadd.f32 0.5, %v184_v47  ;;  %v901_v28 = vld [vmem:[%s1083_s0 + $0x8] sm:$0x1f] }
  0x2c   :  { %v212_v60 = vsub.f32 %v1128_v22, %v199_v20  ;;  %v224_v38 = vadd.f32 0.5, %v185_v48  ;;  %v225_v18 = vadd.f32 0.5, %v186_v49  ;;  %v226_v52 = vadd.f32 0.5, %v187_v50 }
  0x2d   :  { %v227_v62 = vmul.f32 0.025, %v214_v55  ;;  %v1129_v31 = vcvt.s32.f32 %v802_v1  ;;  %v228_v34 = vmul.f32 0.025, %v215_v51  ;;  %v229_v46 = vmul.f32 0.025, %v216_v23 }
  0x2e   :  { %v230_v63 = vmul.f32 0.025, %v217_v57  ;;  %v231_v24 = vmul.f32 0.025, %v218_v10  ;;  %v232_v35 = vmul.f32 0.025, %v219_v44 }
  0x2f   :  { %v213_v32 = vsub.f32 %v1129_v31, %v200_v29  ;;  %v233_v37 = vmul.f32 0.025, %v220_v59  ;;  %v1130_v40 = vsub.s32 5, %v673_v3  ;;  %v234_v41 = vmul.f32 0.025, %v221_v16 }
  0x30   :  { %v235_v43 = vmul.f32 0.025, %v222_v15  ;;  %v889_v47 = vmul.f32 0.025, %v223_v61  ;;  %v1131_v48 = vsub.s32 6, %v673_v3  ;;  %v240_v50 = vadd.f32 0.5, %v201_v19 }
  0x31   :  { %v887_v0 = vrot.slane %v846_v27, %v1130_v40  ;;  %v896_v49 = vmul.f32 0.025, %v224_v38  ;;  %v241_v21 = vadd.f32 0.5, %v202_v45  ;;  %v242_v25 = vadd.f32 0.5, %v203_v39 }
  0x32   :  { %v894_v1 = vrot.slane %v846_v27, %v1131_v48  ;;  %v903_v20 = vmul.f32 0.025, %v225_v18  ;;  %v243_v29 = vadd.f32 0.5, %v204_v36  ;;  %v244_v53 = vadd.f32 0.5, %v205_v30 }
  0x33   :  { %v245_v54 = vadd.f32 0.5, %v206_v26  ;;  %v905_v55 = vmul.f32 0.025, %v226_v52  ;;  %v246_v42 = vadd.f32 0.5, %v207_v17  ;;  %v247_v51 = vadd.f32 0.5, %v208_v2 }
  0x34   :  { %v248_v23 = vadd.f32 0.5, %v209_v4  ;;  %v249_v57 = vadd.f32 0.5, %v210_v56  ;;  %v250_v33 = vadd.f32 0.5, %v211_v58  ;;  %v251_v19 = vadd.f32 0.5, %v212_v60 }
  0x35   :  { %v252_v45 = vadd.f32 0.5, %v213_v32  ;;  %v253_v10 = vmul.f32 0.025, %v240_v50  ;;  %v254_v44 = vmul.f32 0.025, %v241_v21  ;;  %v1132_v22 = vsub.s32 7, %v673_v3 }
  0x36   :  { %v255_v59 = vmul.f32 0.025, %v242_v25  ;;  %v256_v26 = vmul.f32 0.025, %v243_v29  ;;  %v257_v30 = vmul.f32 0.025, %v244_v53  ;;  %v446_v17 = vrot.slane %v901_v28, %v679_v5 }
  0x37   :  { %v912_v36 = vrot.slane %v846_v27, %v1132_v22  ;;  %v258_v16 = vmul.f32 0.025, %v245_v54  ;;  %v259_v2 = vmul.f32 0.025, %v246_v42  ;;  %v260_v4 = vmul.f32 0.025, %v247_v51 }
  0x38   :  { %v261_v60 = vmul.f32 0.025, %v248_v23  ;;  %v262_v15 = vmul.f32 0.025, %v249_v57  ;;  %v263_v38 = vmul.f32 0.025, %v250_v33 }
  0x39   :  { %v264_v40 = vmul.f32 0.025, %v251_v19  ;;  %v265_v48 = vmul.f32 0.025, %v252_v45 }
  0x81   :  { %v907_v39 = vpop.permute.xlu0 %269 }
  0x82   :  { %v272_v56 = vsub.f32 %v227_v62, %v907_v39  ;;  %v273_v58 = vsub.f32 %v228_v34, %v907_v39  ;;  %v274_v61 = vsub.f32 %v229_v46, %v907_v39  ;;  %v275_v3 = vsub.f32 %v230_v63, %v907_v39 }
  0x83   :  { %v276_v18 = vsub.f32 %v231_v24, %v907_v39  ;;  %v277_v52 = vsub.f32 %v232_v35, %v907_v39  ;;  %v278_v31 = vsub.f32 %v233_v37, %v907_v39  ;;  %v279_v62 = vsub.f32 %v234_v41, %v907_v39 }
  0x84   :  { %v280_v34 = vsub.f32 %v235_v43, %v907_v39  ;;  %v281_v50 = vsub.f32 %v889_v47, %v907_v39  ;;  %v282_v46 = vsub.f32 %v896_v49, %v907_v39  ;;  %v285_v63 = vand.u32 2147483647, %v272_v56 }
  0x85   :  { %v286_v21 = vand.u32 2147483647, %v273_v58  ;;  %v287_v24 = vand.u32 2147483647, %v274_v61  ;;  %v288_v25 = vand.u32 2147483647, %v275_v3  ;;  %v283_v3 = vsub.f32 %v903_v20, %v907_v39 }
  0x86   :  { %v300_v32 = vpop.permute.xlu0 %299  ;;  %v289_v37 = vand.u32 2147483647, %v276_v18  ;;  %v290_v53 = vand.u32 2147483647, %v277_v52  ;;  %v291_v54 = vand.u32 2147483647, %v278_v31 }
  0x87   :  { %v302_v35 = vsub.f32 %v253_v10, %v300_v32  ;;  %v303_v29 = vsub.f32 %v254_v44, %v300_v32  ;;  %v304_v42 = vsub.f32 %v255_v59, %v300_v32  ;;  %v292_v51 = vand.u32 2147483647, %v279_v62 }
  0x88   :  { %v305_v41 = vsub.f32 %v256_v26, %v300_v32  ;;  %v306_v23 = vsub.f32 %v257_v30, %v300_v32  ;;  %v307_v43 = vsub.f32 %v258_v16, %v300_v32  ;;  %v293_v57 = vand.u32 2147483647, %v280_v34 }
  0x89   :  { %v308_v33 = vsub.f32 %v259_v2, %v300_v32  ;;  %v309_v47 = vsub.f32 %v260_v4, %v300_v32  ;;  %v310_v19 = vsub.f32 %v261_v60, %v300_v32  ;;  %v311_v45 = vsub.f32 %v262_v15, %v300_v32 }
  0x8a   :  { %v312_v49 = vsub.f32 %v263_v38, %v300_v32  ;;  %v315_v22 = vand.u32 2147483647, %v302_v35  ;;  %v316_v56 = vand.u32 2147483647, %v303_v29  ;;  %v294_v58 = vand.u32 2147483647, %v281_v50 }
  0x8b   :  { %v313_v61 = vsub.f32 %v264_v40, %v300_v32  ;;  %v314_v10 = vsub.f32 %v265_v48, %v300_v32  ;;  %v317_v44 = vand.u32 2147483647, %v304_v42  ;;  %v318_v59 = vand.u32 2147483647, %v305_v41 }
  0x8c   :  { %v319_v18 = vand.u32 2147483647, %v306_v23  ;;  %v320_v26 = vand.u32 2147483647, %v307_v43  ;;  %v284_v30 = vsub.f32 %v905_v55, %v907_v39  ;;  %v321_v16 = vand.u32 2147483647, %v308_v33 }
  0x8d   :  { %v322_v2 = vand.u32 2147483647, %v309_v47  ;;  %v323_v4 = vand.u32 2147483647, %v310_v19  ;;  %v324_v60 = vand.u32 2147483647, %v311_v45  ;;  %v328_v38 = vadd.f32 %v315_v22, %v285_v63 }
  0x8e   :  { %v325_v15 = vand.u32 2147483647, %v312_v49  ;;  %v329_v52 = vadd.f32 %v316_v56, %v286_v21  ;;  %v295_v31 = vand.u32 2147483647, %v282_v46  ;;  %v326_v32 = vand.u32 2147483647, %v313_v61 }
  0x8f   :  { %v327_v40 = vand.u32 2147483647, %v314_v10  ;;  %v330_v48 = vadd.f32 %v317_v44, %v287_v24  ;;  %v296_v62 = vand.u32 2147483647, %v283_v3  ;;  %v331_v20 = vadd.f32 %v318_v59, %v288_v25 }
  0x90   :  { %v332_v34 = vadd.f32 %v319_v18, %v289_v37  ;;  %v333_v50 = vadd.f32 %v320_v26, %v290_v53  ;;  %v297_v35 = vand.u32 2147483647, %v284_v30  ;;  %v334_v29 = vadd.f32 %v321_v16, %v291_v54 }
  0x91   :  { %v335_v42 = vadd.f32 %v322_v2, %v292_v51  ;;  %v336_v55 = vadd.f32 %v323_v4, %v293_v57  ;;  %v337_v39 = vadd.f32 %v324_v60, %v294_v58  ;;  %v338_v41 = vadd.f32 %v325_v15, %v295_v31 }
  0x92   :  { %vm341_vm3 = vcmp.le.f32.partialorder %v328_v38, 0.025  ;;  %vm342_vm4 = vcmp.le.f32.partialorder %v329_v52, 0.025  ;;  %v339_v23 = vadd.f32 %v326_v32, %v296_v62  ;;  %v340_v43 = vadd.f32 %v327_v40, %v297_v35 }
  0x93   :  { %vm343_vm5 = vcmp.le.f32.partialorder %v330_v48, 0.025  ;;  %v450_v46 = vrot.slane %v901_v28, %v682_v6  ;;  %vm344_vm6 = vcmp.le.f32.partialorder %v331_v20, 0.025  ;;  %vm345_vm7 = vcmp.le.f32.partialorder %v332_v34, 0.025 }
  0x94   :  { %vm346_vm8 = vcmp.le.f32.partialorder %v333_v50, 0.025  ;;  %v454_v63 = vrot.slane %v901_v28, %v685_v7  ;;  %vm347_vm9 = vcmp.le.f32.partialorder %v334_v29, 0.025  ;;  %vm348_vm10 = vcmp.le.f32.partialorder %v335_v42, 0.025 }
  0x95   :  { %v648_v21 = vmov 0.0   ;;  %vm349_vm11 = vcmp.le.f32.partialorder %v336_v55, 0.025  ;;  %vm350_vm12 = vcmp.le.f32.partialorder %v337_v39, 0.025  ;;  %v458_v37 = vrot.slane %v901_v28, %v688_v8 }
  0x96   :  { %v595_v24 = vsel %vm341_vm3, 1.0, %v648_v21  ;;  %v596_v25 = vsel %vm342_vm4, 1.0, %v648_v21  ;;  %vm351_vm13 = vcmp.le.f32.partialorder %v338_v41, 0.025  ;;  %vm352_vm14 = vcmp.le.f32.partialorder %v339_v23, 0.025 }
  0x97   :  { %vm353_vm15 = vcmp.le.f32.partialorder %v340_v43, 0.025  ;;  %v597_v53 = vsel %vm343_vm5, 1.0, %v648_v21  ;;  %v462_v54 = vrot.slane %v901_v28, %v691_v9  ;;  %v598_v51 = vsel %vm344_vm6, 1.0, %v648_v21 }
  0x98   :  { %v599_v57 = vsel %vm345_vm7, 1.0, %v648_v21  ;;  %v381_v33 = vsel %vm380_vm2, %v595_v24, 0.0  ;;  %v382_v47 = vsel %vm380_vm2, %v596_v25, 0.0  ;;  %v947_v19 = vsel %vm346_vm8, 1.0, %v648_v21 }
  0x99   :  { %v950_v45 = vsel %vm347_vm9, 1.0, %v648_v21  ;;  %v953_v49 = vsel %vm348_vm10, 1.0, %v648_v21  ;;  %v383_v22 = vadd.f32 %v382_v47, %v381_v33  ;;  %v956_v56 = vsel %vm349_vm11, 1.0, %v648_v21 }
  0x9a   :  { %v959_v58 = vsel %vm350_vm12, 1.0, %v648_v21  ;;  %v962_v61 = vsel %vm351_vm13, 1.0, %v648_v21  ;;  %v384_v10 = vsel %vm380_vm2, %v597_v53, 0.0  ;;  %v966_v44 = vsel %vm352_vm14, 1.0, %v648_v21 }
  0x9b   :  { %v969_v3 = vsel %vm353_vm15, 1.0, %v648_v21  ;;  %v385_v59 = vadd.f32 %v384_v10, %v383_v22  ;;  %v386_v18 = vsel %vm380_vm2, %v598_v51, 0.0  ;;  %v388_v26 = vsel %vm380_vm2, %v599_v57, 0.0 }
  0x9c   :  { %v1133_v30 = vrot.slane %v846_v27, %v679_v5  ;;  %v1134_v2 = vrot.slane %v846_v27, %v682_v6  ;;  %v1135_v60 = vrot.slane %v846_v27, %v685_v7  ;;  %v1136_v52 = vrot.slane %v846_v27, %v688_v8 }
  0x9d   :  { %v387_v38 = vadd.f32 %v386_v18, %v385_v59  ;;  %v1137_v32 = vrot.slane %v846_v27, %v691_v9  ;;  %v481_v48 = vmul.f32 %v947_v19, %v887_v0  ;;  %v482_v6 = vmul.f32 %v950_v45, %v894_v1  ;;  %v1138_v59 = vld [vmem:[#allocation5_spill] sm:$0xff] }
  0x9e   :  { %v476_v16 = vmul.f32 %v595_v24, %v1133_v30  ;;  %v477_v4 = vmul.f32 %v596_v25, %v1134_v2  ;;  %v478_v15 = vmul.f32 %v597_v53, %v1135_v60  ;;  %v479_v31 = vmul.f32 %v598_v51, %v1136_v52 }
  0x9f   :  { %v480_v40 = vmul.f32 %v599_v57, %v1137_v32  ;;  %v483_v62 = vmul.f32 %v953_v49, %v912_v36  ;;  %v484_v7 = vmul.f32 %v956_v56, %v446_v17  ;;  %v485_v8 = vmul.f32 %v959_v58, %v450_v46 }
  0xa0   :  { %v389_v20 = vadd.f32 %v388_v26, %v387_v38  ;;  %v486_v9 = vmul.f32 %v962_v61, %v454_v63  ;;  %v1001_v27 = vmul.f32 %v966_v44, %v458_v37  ;;  %v1004_v0 = vmul.f32 %v969_v3, %v462_v54 }
  0xa1   :  { %v390_v1 = vsel %vm380_vm2, %v947_v19, 0.0  ;;  %v489_v36 = vsel %vm380_vm2, %v476_v16, 0.0  ;;  %v490_v5 = vsel %vm380_vm2, %v477_v4, 0.0  ;;  %v392_v34 = vsel %vm380_vm2, %v950_v45, 0.0  ;;  %v1139_v4 = vld [vmem:[#allocation6_spill] sm:$0xff] }
  0xa2   :  { %v391_v28 = vadd.f32 %v390_v1, %v389_v20  ;;  %v491_v17 = vadd.f32 %v490_v5, %v489_v36  ;;  %v492_v50 = vsel %vm380_vm2, %v478_v15, 0.0  ;;  %v394_v42 = vsel %vm380_vm2, %v953_v49, 0.0 }
  0xa3   :  { %v494_v55 = vsel %vm380_vm2, %v479_v31, 0.0  ;;  %v516_v39 = vmul.f32 %v595_v24, %v694_v11  ;;  %v517_v41 = vmul.f32 %v596_v25, %v697_v12  ;;  %v396_v46 = vsel %vm380_vm2, %v956_v56, 0.0 }
  0xa4   :  { %v393_v35 = vadd.f32 %v392_v34, %v391_v28  ;;  %v493_v29 = vadd.f32 %v492_v50, %v491_v17  ;;  %v496_v63 = vsel %vm380_vm2, %v480_v40, 0.0  ;;  %v518_v21 = vmul.f32 %v597_v53, %v700_v13  ;;  %v1141_v28 = vld [vmem:[#allocation8_spill] sm:$0xff] }
  0xa5   :  { %v398_v54 = vsel %vm380_vm2, %v959_v58, 0.0  ;;  %v498_v47 = vsel %vm380_vm2, %v481_v48, 0.0  ;;  %v519_v11 = vmul.f32 %v598_v51, %v703_v14  ;;  %v529_v12 = vsel %vm380_vm2, %v516_v39, 0.0  ;;  %v1140_v48 = vld [vmem:[#allocation7_spill] sm:$0xff] }
  0xa6   :  { %v395_v23 = vadd.f32 %v394_v42, %v393_v35  ;;  %v495_v43 = vadd.f32 %v494_v55, %v493_v29  ;;  %v530_v24 = vsel %vm380_vm2, %v517_v41, 0.0  ;;  %v400_v13 = vsel %vm380_vm2, %v962_v61, 0.0 }
  0xa7   :  { %v531_v10 = vadd.f32 %v530_v24, %v529_v12  ;;  %v500_v53 = vsel %vm380_vm2, %v482_v6, 0.0  ;;  %v520_v18 = vmul.f32 %v599_v57, %v1138_v59  ;;  %v532_v26 = vsel %vm380_vm2, %v518_v21, 0.0 }
  0xa8   :  { %v397_v37 = vadd.f32 %v396_v46, %v395_v23  ;;  %v497_v33 = vadd.f32 %v496_v63, %v495_v43  ;;  %v402_v51 = vsel %vm380_vm2, %v966_v44, 0.0  ;;  %v502_v2 = vsel %vm380_vm2, %v483_v62, 0.0 }
  0xa9   :  { %v533_v14 = vadd.f32 %v532_v26, %v531_v10  ;;  %v521_v60 = vmul.f32 %v947_v19, %v1139_v4  ;;  %v534_v15 = vsel %vm380_vm2, %v519_v11, 0.0  ;;  %v405_v52 = vsel %vm404_vm0, %v969_v3, 0.0  ;;  %v1146_v10 = vld [vmem:[#allocation13_spill] sm:$0xff] }
  0xaa   :  { %v399_v25 = vadd.f32 %v398_v54, %v397_v37  ;;  %v499_v22 = vadd.f32 %v498_v47, %v497_v33  ;;  %v504_v40 = vsel %vm380_vm2, %v484_v7, 0.0  ;;  %v522_v6 = vmul.f32 %v950_v45, %v1140_v48  ;;  %v1142_v45 = vld [vmem:[#allocation9_spill] sm:$0xff] }
  0xab   :  { %v535_v31 = vadd.f32 %v534_v15, %v533_v14  ;;  %v536_v20 = vsel %vm380_vm2, %v520_v18, 0.0  ;;  %v506_v5 = vsel %vm380_vm2, %v485_v8, 0.0  ;;  %v523_v17 = vmul.f32 %v953_v49, %v1141_v28  ;;  %v1143_v49 = vld [vmem:[#allocation10_spill] sm:$0xff] }
  0xac   :  { %v401_v30 = vadd.f32 %v400_v13, %v399_v25  ;;  %v501_v16 = vadd.f32 %v500_v53, %v499_v22  ;;  %v538_v34 = vsel %vm380_vm2, %v521_v60, 0.0  ;;  %v508_v29 = vsel %vm380_vm2, %v486_v9, 0.0 }
  0xad   :  { %v537_v19 = vadd.f32 %v536_v20, %v535_v31  ;;  %v524_v42 = vmul.f32 %v956_v56, %v1142_v45  ;;  %v540_v55 = vsel %vm380_vm2, %v522_v6, 0.0  ;;  %v510_v8 = vsel %vm380_vm2, %v1001_v27, 0.0  ;;  %v1144_v56 = vld [vmem:[#allocation11_spill] sm:$0xff]  ;;  %v1145_v27 = vld [vmem:[#allocation12_spill] sm:$0xff] }
  0xae   :  { %v403_v38 = vadd.f32 %v402_v51, %v401_v30  ;;  %v503_v57 = vadd.f32 %v502_v2, %v501_v16  ;;  %v114_v32 = vpop.xlane.xlu1 %113  ;;  %v525_v43 = vmul.f32 %v959_v58, %v1143_v49  ;;  %v542_v46 = vsel %vm380_vm2, %v523_v17, 0.0 }
  0xaf   :  { %v115_v62 = vrot.slane %v114_v32, 4  ;;  %v539_v7 = vadd.f32 %v538_v34, %v537_v19  ;;  %v512_v9 = vsel %vm404_vm0, %v1004_v0, 0.0  ;;  %v526_v54 = vmul.f32 %v962_v61, %v1144_v56 }
  0xb0   :  { %v406_v1 = vadd.f32 %v405_v52, %v403_v38  ;;  %v505_v36 = vadd.f32 %v504_v40, %v503_v57  ;;  %v544_v33 = vsel %vm380_vm2, %v524_v42, 0.0  ;;  %v527_v24 = vmul.f32 %v966_v44, %v1145_v27 }
  0xb1   :  { %v116_v50 = vadd.f32 %v115_v62, %v114_v32  ;;  %v541_v23 = vadd.f32 %v540_v55, %v539_v7  ;;  %v546_v58 = vsel %vm380_vm2, %v525_v43, 0.0  ;;  %v528_v13 = vmul.f32 %v969_v3, %v1146_v10 }
  0xb2   :  { %407 = vadd.xlane.f32.xlu1 %v406_v1  ;;  %v507_v35 = vadd.f32 %v506_v5, %v505_v36  ;;  %v548_v0 = vsel %vm380_vm2, %v526_v54, 0.0  ;;  %v550_v53 = vsel %vm380_vm2, %v527_v24, 0.0 }
  0xb3   :  { %v117_v39 = vrot.slane %v116_v50, 2  ;;  %v543_v37 = vadd.f32 %v542_v46, %v541_v23  ;;  %v552_v18 = vsel %vm404_vm0, %v528_v13, 0.0 }
  0xb4   :  { %v509_v41 = vadd.f32 %v508_v29, %v507_v35 }
  0xb5   :  { %v118_v63 = vadd.f32 %v117_v39, %v116_v50  ;;  %v545_v12 = vadd.f32 %v544_v33, %v543_v37 }
  0xb6   :  { %v511_v21 = vadd.f32 %v510_v8, %v509_v41 }
  0xb7   :  { %v119_v47 = vrot.slane %v118_v63, 1  ;;  %v547_v22 = vadd.f32 %v546_v58, %v545_v12 }
  0xb8   :  { %v513_v11 = vadd.f32 %v512_v9, %v511_v21 }
  0xb9   :  { %v120_v25 = vadd.f32 %v119_v47, %v118_v63  ;;  %v549_v61 = vadd.f32 %v548_v0, %v547_v22 }
  0xba   :  { %514 = vadd.xlane.f32.xlu0 %v513_v11 }
  0xbb   :  { %608 = vpush %v120_v25  ;;  %v551_v59 = vadd.f32 %v550_v53, %v549_v61 }
  0xbd   :  { %v553_v26 = vadd.f32 %v552_v18, %v551_v59 }
  0xbf   :  { %554 = vadd.xlane.f32.xlu1 %v553_v26 }
  0xec   :  { %s609_s0 = spop %608 }
  0xed   :  { %v556_v16 = vstv %s609_s0 }
 0x13f   :  { %v408_v44 = vpop.xlane.xlu1 %407 }
 0x140   :  { %v558_v30 = vsub.f32 1600.0, %v408_v44  ;;  %618 = vrcp.f32 %v408_v44 }
 0x142   :  { %620 = vrcp.f32 %v558_v30 }
 0x147   :  { %v515_v60 = vpop.xlane.xlu0 %514 }
 0x14a   :  { %v619_v51 = vpop.eup %618 }
 0x14b   :  { %v560_v15 = vmul.f32 %v619_v51, %v515_v60 }
 0x14c   :  { %v555_v14 = vpop.xlane.xlu1 %554  ;;  %v621_v2 = vpop.eup %620 }
 0x14d   :  { %v557_v3 = vsub.f32 %v556_v16, %v555_v14 }
 0x14f   :  { %v561_v4 = vmul.f32 3.0, %v557_v3 }
 0x151   :  { %v563_v38 = vmul.f32 %v621_v2, %v561_v4 }
 0x153   :  { %v564_v52 = vadd.f32 %v563_v38, %v560_v15 }
 0x155   :  { %v566_v57 = vsel %vm565_vm1, %v564_v52, 0.0 }
 0x156   :  { %567 = vadd.xlane.f32.xlu1 %v566_v57 }
 0x1e3   :  { %v568_v31 = vpop.xlane.xlu1 %567 }
 0x1e4   :  { %v569_v32 = vrot.slane %v568_v31, 4 }
 0x1e6   :  { %v570_v40 = vadd.f32 %v569_v32, %v568_v31 }
 0x1e8   :  { %v571_v48 = vrot.slane %v570_v40, 2 }
 0x1ea   :  { %v572_v6 = vadd.f32 %v571_v48, %v570_v40 }
 0x1ec   :  { %v573_v20 = vrot.slane %v572_v6, 1 }
 0x1ee   :  { %v574_v62 = vadd.f32 %v573_v20, %v572_v6 }
 0x1f0   :  { %610 = vpush %v574_v62 }
 0x221   :  { %s611_s22 = spop %610 }
 0x222   :  { %s578_s23 = smul.f32 0.5, %s611_s22 }
 0x224   :  { %v579_v1 = vstv %s578_s23 }
 0x225   :  { %580 = vst [vmem:[#allocation2] sm:$0x1] %v579_v1 }
 0x226   :  { %633 = shalt.err (!%p630_p4)
}
 0x227   :  { %s634_s28 = scalar_lea.hbm %s1086_s3, 16 }
 0x228   :  { %p635_p5 = scmp.ne.s32.totalorder %s1086_s3, %s634_s28  ;;  %p638_p6 = scmp.lt.u32.totalorder %s634_s28, %s1086_s3 }
 0x22a   :  { %p640_p7 = pnand %p638_p6, %p635_p5 }
 0x22c   :  { %643 = shalt.err (!%p640_p7)
}
 0x22d   :  { %590 = dma.vmem_to_hbm [thread:$0]  %s588_s21, 16, %s1086_s3, [#allocation3]  }
 0x22e   :  { %644 = dma.done.wait [#allocation3], 16  }
 0x22f   :  { %645 = vsyncadd [#allocation3], 4294967280 }
 0x230   :  { %594 = vsyncpa [#allocation3], 1 }

</bundles_post_ra>
